<compile_context>
chip_gen: v6e
topology: v6e:2x2x1
jax: 0.10.0
libtpu: 0.0.40
codegen_flags: <defaults>
</compile_context>

<pallas_src>
import jax
import jax.numpy as jnp
from jax.experimental import pallas as pl
from jax.experimental.pallas import tpu as pltpu


def mlp_kernel(x_ref, w_ref, b_ref, o_ref):
    # x arrives in its native dtype; cast on the VPU so the wrapper never makes
    # an extra HBM pass over the activations.
    x = x_ref[...].astype(w_ref.dtype)
    # MXU matmul, f32 accumulation.
    y = jnp.dot(x, w_ref[...], preferred_element_type=jnp.float32)
    y = y + b_ref[...]                                # f32 bias add (VPU)
    # NOTE: rows/cols belonging to ragged boundary tiles contain block-padding
    # garbage here; tanh(garbage) is computed but the store below is masked to
    # the real (B, H_out) extent, so valid outputs are never contaminated.
    o_ref[...] = jnp.tanh(y).astype(o_ref.dtype)      # f32 tanh on EUP, cast


def prepare_mlp_params(weight_io, bias, *, compute_dtype=jnp.bfloat16):
    """One-time parameter preparation (hoisted out of the per-call path).

    weight_io: [H_in, H_out]  (= PyTorch nn.Linear weight.T)
    bias:      [H_out]
    """
    w_prep = weight_io.astype(compute_dtype)
    b_prep = bias.astype(jnp.float32).reshape(1, -1)
    return w_prep, b_prep


def mlp_layer(features, w_prep, b_prep, *, tm=256, tn=512,
              vmem_budget_bytes=32 << 20):
    """features: [B, H_in]; w_prep: [H_in, H_out]; b_prep: [1, H_out]."""
    B, K = features.shape
    Kw, N = w_prep.shape
    assert Kw == K, (Kw, K)
    assert b_prep.shape == (1, N), b_prep.shape

    out_dtype = features.dtype
    x_isz = features.dtype.itemsize
    w_isz = w_prep.dtype.itemsize
    out_isz = jnp.dtype(out_dtype).itemsize

    # ---- batch (M) tile: multiple of 16 (bf16 LHS packs 2 rows per sublane) ----
    if B <= tm:
        tm = B                                  # single row tile (full dim -> legal)
    else:
        tm = max(16, (tm // 16) * 16)
    nb = pl.cdiv(B, tm)

    # ---- output-hidden (N) tile: lane-dense multiple of 128 when possible ----
    if N < 128:
        tn = N                                  # single tile, full dim -> legal
    else:
        tn = max(128, (min(tn, N) // 128) * 128)
        if nb == 1 and N >= 256:
            # v7x shards "parallel" axes over 2 TensorCores: make sure the only
            # non-trivial axis has >= 2 grid points.
            tn = min(tn, max(128, ((N // 2) // 128) * 128))
    nn = pl.cdiv(N, tn)

    # ---- VMEM budget: double-buffered per-step working set ----
    def working_set(tm_, tn_):
        return 2 * (tm_ * K * x_isz + K * tn_ * w_isz + tn_ * 4 + tm_ * tn_ * out_isz)

    for _ in range(16):
        if working_set(tm, tn) <= vmem_budget_bytes:
            break
        if K * tn * w_isz >= tm * K * x_isz and tn > 128:
            tn = max(128, ((tn // 2) // 128) * 128)
        elif tm > 16:
            tm = max(16, ((tm // 2) // 16) * 16)
        elif tn > 128:
            tn = max(128, ((tn // 2) // 128) * 128)
        else:
            # TODO(synk): add a K grid axis (f32 acc scratch + pl.when epilogue)
            # for hidden sizes so large that even minimum tiles exceed the budget.
            break
    nb = pl.cdiv(B, tm)
    nn = pl.cdiv(N, tn)

    # ---- grid order: minimize redundant HBM re-fetches (Pallas re-DMAs a block
    # only when its index changes between consecutive grid steps) ----
    x_total = B * K * x_isz
    w_total = K * N * w_isz
    traffic_n_outer = nn * w_total + (nn if nb > 1 else 1) * x_total
    traffic_b_outer = (nb if nn > 1 else 1) * w_total + nb * x_total
    batch_outer = traffic_b_outer <= traffic_n_outer

    if batch_outer:
        grid = (nb, nn)
        x_spec = pl.BlockSpec((tm, K), lambda b, n: (b, 0))
        w_spec = pl.BlockSpec((K, tn), lambda b, n: (0, n))
        bias_spec = pl.BlockSpec((1, tn), lambda b, n: (0, n))
        o_spec = pl.BlockSpec((tm, tn), lambda b, n: (b, n))
    else:
        grid = (nn, nb)
        x_spec = pl.BlockSpec((tm, K), lambda n, b: (b, 0))
        w_spec = pl.BlockSpec((K, tn), lambda n, b: (0, n))
        bias_spec = pl.BlockSpec((1, tn), lambda n, b: (0, n))
        o_spec = pl.BlockSpec((tm, tn), lambda n, b: (b, n))

    # Explicit scoped-VMEM limit: above v5e's 16 MiB default when needed, with
    # headroom, but safely below v7x's 64 MiB physical VMEM.
    vmem_limit = int(min(48 << 20, max(2 * working_set(tm, tn), 16 << 20)))

    cost = pl.CostEstimate(
        flops=2 * B * K * N,
        transcendentals=B * N,
        bytes_accessed=x_total + w_total + N * 4 + B * N * out_isz,
    )

    return pl.pallas_call(
        mlp_kernel,
        out_shape=jax.ShapeDtypeStruct((B, N), out_dtype),
        grid_spec=pltpu.PrefetchScalarGridSpec(
            num_scalar_prefetch=0,
            grid=grid,
            in_specs=[x_spec, w_spec, bias_spec],
            out_specs=o_spec,
        ),
        compiler_params=pltpu.CompilerParams(
            dimension_semantics=("parallel", "parallel"),
            vmem_limit_bytes=vmem_limit,
        ),
        cost_estimate=cost,
    )(features, w_prep, b_prep)


if __name__ == "__main__":
    key = jax.random.PRNGKey(0)

    # --- Test 1: demo shape from the module (batch of CLS vectors, hidden=32) ---
    batch, hidden = 8, 32
    kx, kw, kb, k2x, k2w, k2b = jax.random.split(key, 6)

    features = jax.random.normal(kx, (batch, hidden), dtype=jnp.float32)
    # nn.Linear parameter shapes: weight [out, in], bias [out].
    weight_oi = jax.random.normal(kw, (hidden, hidden), dtype=jnp.float32) * 0.05
    bias = jax.random.normal(kb, (hidden,), dtype=jnp.float32) * 0.05
    weight_io = weight_oi.T                     # kernel layout: [in, out]

    w_prep, b_prep = prepare_mlp_params(weight_io, bias)   # one-time prep
    out = jax.block_until_ready(mlp_layer(features, w_prep, b_prep))

    ref = jnp.tanh(features @ weight_io + bias[None, :])
    assert out.shape == ref.shape and out.dtype == ref.dtype
    assert jnp.allclose(out, ref, atol=3e-2, rtol=3e-2), "test1 mismatch"

    # --- Test 2: exercise the tiled path (multi-tile M and N, ragged batch tile) ---
    B2, H2 = 48, 256
    x2 = jax.random.normal(k2x, (B2, H2), dtype=jnp.float32)
    w2_io = jax.random.normal(k2w, (H2, H2), dtype=jnp.float32) * 0.05
    b2 = jax.random.normal(k2b, (H2,), dtype=jnp.float32) * 0.05

    w2_prep, b2_prep = prepare_mlp_params(w2_io, b2)
    out2 = jax.block_until_ready(mlp_layer(x2, w2_prep, b2_prep, tm=32, tn=128))

    ref2 = jnp.tanh(x2 @ w2_io + b2[None, :])
    assert out2.shape == ref2.shape
    assert jnp.allclose(out2, ref2, atol=3e-2, rtol=3e-2), "test2 mismatch"

    print("KERNEL_OK")
</pallas_src>

<mosaic_0001>
module attributes {stable_mosaic.version = 11 : i64} {
  func.func @mlp_kernel(%arg0: i32, %arg1: i32, %arg2: memref<8x32xf32, #tpu.memory_space<vmem>>, %arg3: memref<32x32xbf16, #tpu.memory_space<vmem>>, %arg4: memref<1x32xf32, #tpu.memory_space<vmem>>, %arg5: memref<8x32xf32, #tpu.memory_space<vmem>>) attributes {dimension_semantics = [#tpu.dimension_semantics<parallel>, #tpu.dimension_semantics<parallel>], iteration_bounds = array<i64: 1, 1>, scalar_prefetch = 0 : i64, scratch_operands = 0 : i64, tpu.core_type = #tpu.core_type<tc>, window_params = [{transform_indices = @transform_0, window_bounds = array<i64: 8, 32>}, {transform_indices = @transform_1, window_bounds = array<i64: 32, 32>}, {transform_indices = @transform_2, window_bounds = array<i64: 1, 32>}, {transform_indices = @transform_3, window_bounds = array<i64: 8, 32>}]} {
    %c0 = arith.constant 0 : index
    %c0_0 = arith.constant 0 : index
    %0 = vector.load %arg2[%c0, %c0_0] : memref<8x32xf32, #tpu.memory_space<vmem>>, vector<8x32xf32>
    %1 = arith.truncf %0 : vector<8x32xf32> to vector<8x32xbf16>
    %c0_1 = arith.constant 0 : index
    %c0_2 = arith.constant 0 : index
    %2 = vector.load %arg3[%c0_1, %c0_2] : memref<32x32xbf16, #tpu.memory_space<vmem>>, vector<32x32xbf16>
    %cst = arith.constant dense<0.000000e+00> : vector<8x32xf32>
    %3 = tpu.matmul %1, %2, %cst {dimension_numbers = #tpu.dot_dimension_numbers<[1], [0], [0], [1], [0, 0, 1, 1], [], []>} : vector<8x32xbf16>, vector<32x32xbf16>, vector<8x32xf32> -> vector<8x32xf32>
    %c0_3 = arith.constant 0 : index
    %c0_4 = arith.constant 0 : index
    %4 = vector.load %arg4[%c0_3, %c0_4] : memref<1x32xf32, #tpu.memory_space<vmem>>, vector<1x32xf32>
    %5 = vector.broadcast %4 : vector<1x32xf32> to vector<8x32xf32>
    %6 = arith.addf %3, %5 : vector<8x32xf32>
    %7 = math.tanh %6 : vector<8x32xf32>
    %c0_5 = arith.constant 0 : index
    %c0_6 = arith.constant 0 : index
    %8 = vector.load %arg5[%c0_5, %c0_6] : memref<8x32xf32, #tpu.memory_space<vmem>>, vector<8x32xf32>
    tpu.vector_store %arg5[%c0_5, %c0_6], %7 {strides = array<i32>} : memref<8x32xf32, #tpu.memory_space<vmem>>, vector<8x32xf32>,
    return
  }
  func.func @transform_0(%arg0: i32, %arg1: i32) -> (i32, i32) {
    %c0_i32 = arith.constant 0 : i32
    %c0_i32_0 = arith.constant 0 : i32
    return %arg0, %c0_i32 : i32, i32
  }
  func.func @transform_1(%arg0: i32, %arg1: i32) -> (i32, i32) {
    %c0_i32 = arith.constant 0 : i32
    %c0_i32_0 = arith.constant 0 : i32
    return %c0_i32, %arg1 : i32, i32
  }
  func.func @transform_2(%arg0: i32, %arg1: i32) -> (i32, i32) {
    %c0_i32 = arith.constant 0 : i32
    %c0_i32_0 = arith.constant 0 : i32
    return %c0_i32, %arg1 : i32, i32
  }
  func.func @transform_3(%arg0: i32, %arg1: i32) -> (i32, i32) {
    %c0_i32 = arith.constant 0 : i32
    return %arg0, %arg1 : i32, i32
  }
}

</mosaic_0001>

<bundles_post_ra>
// kernel: tpu_custom_call.1
= control target key start
LH: loop header
LB: loop body
LE: loop exit
PB: predicated region body
PF: predicated region fallthrough
CT: control target
= control target key end

     0   :  { %8 = vsyncpa [#allocation3], 0  ;;  %s260_s0 = inlined_call_operand.hbm [shape: f32[8,32], index: 0, kind: input, shape index: {}]   ;;  %s261_s1 = inlined_call_operand.hbm [shape: bf16[32,32], index: 1, kind: input, shape index: {}]   ;;  %s262_s2 = inlined_call_operand.vmem [shape: f32[1,32], index: 2, kind: input, shape index: {}]   ;;  %s263_s3 = inlined_call_operand.hbm [shape: f32[8,32], index: 3, kind: output, shape index: {}]  }
   0x1   :  { %9 = vsyncpa [#allocation6], 0 }
   0x2   :  { %10 = vsyncpa [#allocation4], 0  ;;  %s221_s12 = smov [#allocation2]   ;;  %s222_s14 = smov [#allocation5]  }
   0x3   :  { %s17_s13 = sshll.u32 %s221_s12, 4  ;;  %s26_s15 = sshll.u32 %s222_s14, 4  ;;  %s18_s13 = int_to_ptr.vmem [resolvable:$true] %s17_s13  ;;  %s27_s15 = int_to_ptr.vmem [resolvable:$true] %s26_s15 }
   0x4   :  { %s163_s16 = scalar_lea.vmem %s18_s13, 128  ;;  %p168_p1 = scmp.lt.s32.totalorder %s18_s13, %s18_s13 }
   0x5   :  { %p164_p0 = scmp.ne.s32.totalorder %s18_s13, %s163_s16  ;;  %p169_p2 = scmp.lt.s32.totalorder %s163_s16, %s163_s16 }
   0x7   :  { %p170_p3 = por %p169_p2, %p168_p1 }
   0x9   :  { %p171_p4 = pnand %p170_p3, %p164_p0 }
   0xb   :  { %174 = shalt.err (!%p171_p4)
}
   0xc   :  { %20 = dma.hbm_to_vmem [thread:$0]  %s260_s0, 128, %s18_s13, [#allocation3]  }
   0xd   :  { %s183_s19 = scalar_lea.vmem %s27_s15, 256  ;;  %p188_p6 = scmp.lt.s32.totalorder %s27_s15, %s27_s15 }
   0xe   :  { %p184_p5 = scmp.ne.s32.totalorder %s27_s15, %s183_s19  ;;  %p189_p7 = scmp.lt.s32.totalorder %s183_s19, %s183_s19 }
  0x10   :  { %p190_p8 = por %p189_p7, %p188_p6 }
  0x12   :  { %p191_p9 = pnand %p190_p8, %p184_p5 }
  0x14   :  { %194 = shalt.err (!%p191_p9)
}
  0x15   :  { %s223_s20 = smov 64   ;;  %s224_s21 = smov 4  }
  0x16   :  { %32 = dma.hbm_to_vmem [thread:$0]  %s261_s1, 256, %s27_s15, [#allocation6], %s223_s20, %s223_s20, %s224_s21  }
  0x17   :  { %215 = dma.done.wait [#allocation3], 128  }
  0x18   :  { %216 = vsyncadd [#allocation3], 4294967168 }
  0x19   :  { %217 = dma.done.wait [#allocation6], 256  }
  0x1a   :  { %218 = vsyncadd [#allocation6], 4294967040  ;;  %v225_v0 = vmov 0.0   ;;  %vm226_vm0 = vmmov 0   ;;  %v151_v1 = vld [vmem:[#allocation5 + $0x8] sm:$0xff]   ;;  %v152_v2 = vld [vmem:[#allocation5] sm:$0xff]  }
  0x1b   :  { %136 = vmatprep.subr.bf16.mxu0 %v225_v0  ;;  %140 = vmatprep.mubr.msk.bf16.mxu0 %vm226_vm0, %v225_v0  ;;  %v42_v3 = vld [vmem:[#allocation2] sm:$0xff]  ;;  %vm67_vm1 = vcmask 261120   ;;  %s227_s1 = smov [#allocation7]  }
  0x1c   :  { %137 = vmatpush3.bf16.msra.mxu0 %v151_v1  ;;  %v43_v4 = vpack.c.bf16 %v42_v3, %v42_v3  ;;  %v129_v5 = vld [vmem:[%s262_s2] ss:$0 sm:$0xff]  ;;  %s119_s25 = sshll.u32 %s227_s1, 4  ;;  %s120_s25 = int_to_ptr.vmem [resolvable:$true] %s119_s25 }
  0x1d   :  { %138 = vmatprep.subr.bf16.mxu0 %v225_v0  ;;  %s195_s26 = scalar_lea.vmem %s120_s25, 128  ;;  %p200_p11 = scmp.lt.s32.totalorder %s120_s25, %s120_s25 }
  0x1e   :  { %p196_p10 = scmp.ne.s32.totalorder %s120_s25, %s195_s26  ;;  %p201_p12 = scmp.lt.s32.totalorder %s195_s26, %s195_s26 }
  0x20   :  { %139 = vmatpush3.bf16.msra.mxu0 %v152_v2  ;;  %p202_p13 = por %p201_p12, %p200_p11 }
  0x22   :  { %p203_p0 = pnand %p202_p13, %p196_p10 }
  0x23   :  { %141 = vmatmul.mubr.msk.bf16.vlgmr.msra.gmra.mxu0 %vm67_vm1, %v43_v4 }
  0xe3   :  { %v105_v6 = vpop.f32.mrf.mxu0 }
  0xe4   :  { %v106_v7 = vadd.f32 %v129_v5, %v105_v6 }
  0xe5   :  { %v142_v8 = vpop.f32.mrf.mxu0 }
  0xe6   :  { %153 = vtanh.f32 %v106_v7 }
  0xe7   :  { %v108_v9 = vpop.f32.mrf.mxu0 }
  0xe9   :  { %v143_v10 = vpop.f32.mrf.mxu0 }
  0xf3   :  { %v154_v11 = vpop.eup %153 }
  0xf4   :  { %112 = vst.msk [vmem:[#allocation7] sm:$0xff] %vm67_vm1, %v154_v11 }
  0xf5   :  { %206 = shalt.err (!%p203_p0)
}
  0xf6   :  { %122 = dma.vmem_to_hbm [thread:$0]  %s120_s25, 128, %s263_s3, [#allocation4]  }
  0xf7   :  { %219 = dma.done.wait [#allocation4], 128  }
  0xf8   :  { %220 = vsyncadd [#allocation4], 4294967168 }
  0xf9   :  { %126 = vsyncpa [#allocation3], 1 }
  0xfa   :  { %127 = vsyncpa [#allocation6], 1 }
  0xfb   :  { %128 = vsyncpa [#allocation4], 1 }

</bundles_post_ra>
